<compile_context>
chip_gen: v7x
topology: tpu7x:2x2x1
jax: 0.10.0
libtpu: 0.0.40
codegen_flags: <defaults>
</compile_context>

<pallas_src>
import functools

import jax
import jax.numpy as jnp
from jax import lax
from jax.experimental import pallas as pl
from jax.experimental.pallas import tpu as pltpu


def _round_up(x, m):
    return ((x + m - 1) // m) * m


# ----------------------------- Pallas kernel -------------------------------
def _transh_loss_kernel(ent_ref, rnorm_ref, rhyper_ref, out_ref, *,
                        margin, C, epsilon, batch, block_rows):
    """One batch tile of the TransH loss.

    ent_ref    : [4, bB, D]  rows (h, h_c, t, t_c)
    rnorm_ref  : [2, bB, D]  rows (r, r_c)
    rhyper_ref : [2, bB, D]  rows (r, r_c)
    out_ref    : [1, 1, 128] per-block partial loss (broadcast over lanes)
    """
    f32 = jnp.float32
    e = ent_ref[...].astype(f32)          # [4, bB, D]
    w = rnorm_ref[...].astype(f32)        # [2, bB, D]
    rh = rhyper_ref[...].astype(f32)      # [2, bB, D]

    # Validity mask for batch-padding rows.
    row = (pl.program_id(0) * block_rows
           + lax.broadcasted_iota(jnp.int32, (block_rows, 1), 0))    # [bB, 1]
    valid = (row < batch).astype(f32)                                # [bB, 1]

    # --- unit hyperplane normals (F.normalize p=2) via EUP rsqrt -----------
    w_sq = jnp.sum(w * w, axis=-1, keepdims=True)                    # [2,bB,1]
    w_unit = w * lax.rsqrt(jnp.maximum(w_sq, 1e-24))

    # --- distances: project the difference once ----------------------------
    #   h_proj + rh - t_proj == (h - t) - <h - t, w> w + rh
    diff = e[0:2] - e[2:4]                                           # [2,bB,D]
    d = diff - jnp.sum(diff * w_unit, axis=-1, keepdims=True) * w_unit + rh
    score = jnp.sum(jnp.abs(d), axis=-1, keepdims=True)              # [2,bB,1] p=1

    # MarginRankingLoss(margin, reduction='mean') with y = -1.
    hinge = jnp.maximum(score[0] - score[1] + margin, 0.0)           # [bB, 1]
    hinge_sum = jnp.sum(hinge * valid)

    # scale loss over cat([h, t, h_c, t_c])
    e_sq = jnp.sum(e * e, axis=-1, keepdims=True)                    # [4,bB,1]
    scale_sum = jnp.sum(jnp.maximum(e_sq - 1.0, 0.0) * valid[None])

    # orthogonal loss over cat([r, r_c]): relu(<rh, w>^2 / ||rh||_1^2 - eps^2)
    dot2 = jnp.sum(rh * w, axis=-1, keepdims=True) ** 2              # [2,bB,1]
    nrm2 = jnp.sum(jnp.abs(rh), axis=-1, keepdims=True) ** 2
    inv_nrm2 = pl.reciprocal(jnp.maximum(nrm2, 1e-30), approx=True)  # EUP
    ortho = jnp.maximum(dot2 * inv_nrm2 - epsilon * epsilon, 0.0)
    ortho_sum = jnp.sum(ortho * valid[None])

    partial = (hinge_sum / batch
               + C * (scale_sum / (4.0 * batch) + ortho_sum / (2.0 * batch)))
    out_ref[...] = jnp.broadcast_to(partial.astype(f32), out_ref.shape)


# ------------------------------- forward ------------------------------------
@functools.partial(jax.jit,
                   static_argnames=("margin", "C", "epsilon", "block_rows"))
def transh_forward(entity_emb, rel_norm_emb, rel_hyper_emb,
                   current_triples, corrupted_triples, *,
                   margin=1.0, C=1.0, epsilon=1e-5, block_rows=512):
    B = current_triples.shape[0]
    D = entity_emb.shape[1]

    h, r, t = current_triples[:, 0], current_triples[:, 1], current_triples[:, 2]
    hc, rc, tc = (corrupted_triples[:, 0], corrupted_triples[:, 1],
                  corrupted_triples[:, 2])

    # Batch tile size: multiple of 8 (sublane), at most block_rows.
    bB = _round_up(min(block_rows, _round_up(B, 8)), 8)
    B_pad = _round_up(B, bB)
    pad = B_pad - B

    def padi(x):
        return jnp.pad(x, (0, pad)) if pad else x

    # Stack indices so each table is gathered exactly once, contiguously.
    ent_idx = jnp.stack([padi(h), padi(hc), padi(t), padi(tc)])      # [4, B_pad]
    rel_idx = jnp.stack([padi(r), padi(rc)])                         # [2, B_pad]

    ent = jnp.take(entity_emb, ent_idx, axis=0)                      # [4, B_pad, D]
    rnorm = jnp.take(rel_norm_emb, rel_idx, axis=0)                  # [2, B_pad, D]
    rhyper = jnp.take(rel_hyper_emb, rel_idx, axis=0)                # [2, B_pad, D]

    num_blocks = B_pad // bB
    kernel = functools.partial(
        _transh_loss_kernel, margin=float(margin), C=float(C),
        epsilon=float(epsilon), batch=int(B), block_rows=int(bB))

    partials = pl.pallas_call(
        kernel,
        out_shape=jax.ShapeDtypeStruct((num_blocks, 1, 128), jnp.float32),
        grid_spec=pltpu.PrefetchScalarGridSpec(
            num_scalar_prefetch=0,
            grid=(num_blocks,),
            in_specs=[
                pl.BlockSpec((4, bB, D), lambda i: (0, i, 0)),
                pl.BlockSpec((2, bB, D), lambda i: (0, i, 0)),
                pl.BlockSpec((2, bB, D), lambda i: (0, i, 0)),
            ],
            out_specs=pl.BlockSpec((1, 1, 128), lambda i: (i, 0, 0)),
        ),
        compiler_params=pltpu.CompilerParams(
            dimension_semantics=("parallel",),
            vmem_limit_bytes=48 * 1024 * 1024),
    )(ent, rnorm, rhyper)

    return jnp.sum(partials[:, 0, 0])


# ------------------------------- wrapper ------------------------------------
class TransHPallas:
    def __init__(self, entity_num, relation_num, embed_size,
                 margin=1.0, C=1.0, epsilon=1e-5, norm=1.0, key=None):
        assert norm == 1.0, "kernel implements the default p=1 score/ortho norm"
        self.entity_num = entity_num
        self.relation_num = relation_num
        self.embed_size = embed_size
        self.margin = float(margin)
        self.C = float(C)
        self.epsilon = float(epsilon)

        if key is None:
            key = jax.random.PRNGKey(0)
        k_ent, k_rn, k_rh = jax.random.split(key, 3)

        def xavier_uniform(k, fan_in, fan_out):
            bound = (6.0 / (fan_in + fan_out)) ** 0.5
            return jax.random.uniform(k, (fan_in, fan_out),
                                      minval=-bound, maxval=bound,
                                      dtype=jnp.float32)

        # Deterministic synthetic parameters (same shapes as nn.Embedding weights).
        self.entity_embedding = xavier_uniform(k_ent, entity_num, embed_size)
        self.relation_norm_embedding = xavier_uniform(k_rn, relation_num, embed_size)
        self.relation_hyper_embedding = xavier_uniform(k_rh, relation_num, embed_size)

    def __call__(self, current_triples, corrupted_triples):
        return transh_forward(self.entity_embedding,
                              self.relation_norm_embedding,
                              self.relation_hyper_embedding,
                              current_triples, corrupted_triples,
                              margin=self.margin, C=self.C,
                              epsilon=self.epsilon)


# ----------------------------- pure-JAX reference ----------------------------
def reference_loss(model, cur, cor):
    def l2n(w):
        n = jnp.sqrt(jnp.sum(w * w, -1, keepdims=True))
        return w / jnp.maximum(n, 1e-12)

    def proj(e, w):
        return e - jnp.sum(e * w, -1, keepdims=True) * w

    def dist(hh, rr, tt):
        hd = jnp.take(model.entity_embedding, hh, axis=0)
        tl = jnp.take(model.entity_embedding, tt, axis=0)
        wn = l2n(jnp.take(model.relation_norm_embedding, rr, axis=0))
        rh = jnp.take(model.relation_hyper_embedding, rr, axis=0)
        d = proj(hd, wn) + rh - proj(tl, wn)
        return jnp.sum(jnp.abs(d), -1)

    h, r, t = cur[:, 0], cur[:, 1], cur[:, 2]
    hc, rc, tc = cor[:, 0], cor[:, 1], cor[:, 2]
    pos, neg = dist(h, r, t), dist(hc, rc, tc)
    ml = jnp.mean(jnp.maximum(pos - neg + model.margin, 0.0))
    ents = jnp.take(model.entity_embedding, jnp.concatenate([h, t, hc, tc]), axis=0)
    rel = jnp.take(model.relation_hyper_embedding, jnp.concatenate([r, rc]), axis=0)
    w = jnp.take(model.relation_norm_embedding, jnp.concatenate([r, rc]), axis=0)
    sl = jnp.sum(jnp.maximum(jnp.sum(ents ** 2, -1) - 1.0, 0.0))
    ol = jnp.sum(jnp.maximum(jnp.sum(rel * w, -1) ** 2
                             / jnp.sum(jnp.abs(rel), -1) ** 2
                             - model.epsilon ** 2, 0.0))
    return ml + model.C * (sl / ents.shape[0] + ol / rel.shape[0])


# --------------------------------- main --------------------------------------
if __name__ == "__main__":
    entity_num, relation_num, embed_size = 50, 10, 32
    batch = 8

    model = TransHPallas(entity_num, relation_num, embed_size,
                         margin=1.0, C=1.0, epsilon=1e-5, norm=1.0,
                         key=jax.random.PRNGKey(0))

    key = jax.random.PRNGKey(0)
    k1, k2, k3, k4, k5, k6 = jax.random.split(key, 6)
    current_triples = jnp.stack([
        jax.random.randint(k1, (batch,), 0, entity_num),
        jax.random.randint(k2, (batch,), 0, relation_num),
        jax.random.randint(k3, (batch,), 0, entity_num),
    ], axis=1).astype(jnp.int32)                        # [B, 3]
    corrupted_triples = jnp.stack([
        jax.random.randint(k4, (batch,), 0, entity_num),
        jax.random.randint(k5, (batch,), 0, relation_num),
        jax.random.randint(k6, (batch,), 0, entity_num),
    ], axis=1).astype(jnp.int32)                        # [B, 3]

    loss = model(current_triples, corrupted_triples)
    jax.block_until_ready(loss)

    ref = jax.block_until_ready(reference_loss(model, current_triples,
                                               corrupted_triples))
    # approx=True reciprocal (EUP) -> loosen tolerance slightly vs exact ref.
    assert jnp.allclose(loss, ref, rtol=2e-3, atol=1e-3), (loss, ref)

    # Second check with a batch that exercises the in-kernel padding mask.
    cur5, cor5 = current_triples[:5], corrupted_triples[:5]
    loss5 = jax.block_until_ready(model(cur5, cor5))
    ref5 = jax.block_until_ready(reference_loss(model, cur5, cor5))
    assert jnp.allclose(loss5, ref5, rtol=2e-3, atol=1e-3), (loss5, ref5)

    print("KERNEL_OK")
</pallas_src>

<mosaic_0001>
module attributes {stable_mosaic.version = 11 : i64} {
  func.func @_transh_loss_kernel(%arg0: i32, %arg1: memref<4x8x32xf32, #tpu.memory_space<vmem>>, %arg2: memref<2x8x32xf32, #tpu.memory_space<vmem>>, %arg3: memref<2x8x32xf32, #tpu.memory_space<vmem>>, %arg4: memref<1x1x128xf32, #tpu.memory_space<vmem>>) attributes {dimension_semantics = [#tpu.dimension_semantics<parallel>], iteration_bounds = array<i64: 1>, scalar_prefetch = 0 : i64, scratch_operands = 0 : i64, tpu.core_type = #tpu.core_type<tc>, window_params = [{transform_indices = @transform_0, window_bounds = array<i64: 4, 8, 32>}, {transform_indices = @transform_1, window_bounds = array<i64: 2, 8, 32>}, {transform_indices = @transform_2, window_bounds = array<i64: 2, 8, 32>}, {transform_indices = @transform_3, window_bounds = array<i64: 1, 1, 128>}]} {
    %c0 = arith.constant 0 : index
    %c0_0 = arith.constant 0 : index
    %c0_1 = arith.constant 0 : index
    %0 = vector.load %arg1[%c0, %c0_0, %c0_1] : memref<4x8x32xf32, #tpu.memory_space<vmem>>, vector<4x8x32xf32>
    %c0_2 = arith.constant 0 : index
    %c0_3 = arith.constant 0 : index
    %c0_4 = arith.constant 0 : index
    %1 = vector.load %arg2[%c0_2, %c0_3, %c0_4] : memref<2x8x32xf32, #tpu.memory_space<vmem>>, vector<2x8x32xf32>
    %c0_5 = arith.constant 0 : index
    %c0_6 = arith.constant 0 : index
    %c0_7 = arith.constant 0 : index
    %2 = vector.load %arg3[%c0_5, %c0_6, %c0_7] : memref<2x8x32xf32, #tpu.memory_space<vmem>>, vector<2x8x32xf32>
    %c8_i32 = arith.constant 8 : i32
    %3 = arith.muli %arg0, %c8_i32 : i32
    %4 = tpu.iota {dimensions = array<i32: 0>} : vector<8x1xi32>
    %5 = vector.broadcast %3 : i32 to vector<8x1xi32>
    %6 = arith.addi %5, %4 : vector<8x1xi32>
    %c8_i32_8 = arith.constant 8 : i32
    %7 = vector.broadcast %c8_i32_8 : i32 to vector<8x1xi32>
    %8 = arith.cmpi slt, %6, %7 : vector<8x1xi32>
    %9 = arith.extui %8 : vector<8x1xi1> to vector<8x1xi32>
    %10 = arith.sitofp %9 : vector<8x1xi32> to vector<8x1xf32>
    %11 = arith.mulf %1, %1 : vector<2x8x32xf32>
    %cst = arith.constant dense<0.000000e+00> : vector<2x8xf32>
    %12 = vector.multi_reduction <add>, %11, %cst [2] : vector<2x8x32xf32> to vector<2x8xf32>
    %13 = vector.shape_cast %12 : vector<2x8xf32> to vector<2x8x1xf32>
    %cst_9 = arith.constant 1.000000e-24 : f32
    %14 = vector.broadcast %cst_9 : f32 to vector<2x8x1xf32>
    %15 = arith.maximumf %13, %14 : vector<2x8x1xf32>
    %16 = math.rsqrt %15 : vector<2x8x1xf32>
    %17 = vector.broadcast %16 : vector<2x8x1xf32> to vector<2x8x32xf32>
    %18 = arith.mulf %1, %17 : vector<2x8x32xf32>
    %19 = vector.extract_strided_slice %0 {offsets = [0, 0, 0], sizes = [2, 8, 32], strides = [1, 1, 1]} : vector<4x8x32xf32> to vector<2x8x32xf32>
    %20 = vector.extract_strided_slice %0 {offsets = [2, 0, 0], sizes = [2, 8, 32], strides = [1, 1, 1]} : vector<4x8x32xf32> to vector<2x8x32xf32>
    %21 = arith.subf %19, %20 : vector<2x8x32xf32>
    %22 = arith.mulf %21, %18 : vector<2x8x32xf32>
    %cst_10 = arith.constant dense<0.000000e+00> : vector<2x8xf32>
    %23 = vector.multi_reduction <add>, %22, %cst_10 [2] : vector<2x8x32xf32> to vector<2x8xf32>
    %24 = vector.shape_cast %23 : vector<2x8xf32> to vector<2x8x1xf32>
    %25 = vector.broadcast %24 : vector<2x8x1xf32> to vector<2x8x32xf32>
    %26 = arith.mulf %25, %18 : vector<2x8x32xf32>
    %27 = arith.subf %21, %26 : vector<2x8x32xf32>
    %28 = arith.addf %27, %2 : vector<2x8x32xf32>
    %29 = math.absf %28 : vector<2x8x32xf32>
    %cst_11 = arith.constant dense<0.000000e+00> : vector<2x8xf32>
    %30 = vector.multi_reduction <add>, %29, %cst_11 [2] : vector<2x8x32xf32> to vector<2x8xf32>
    %31 = vector.shape_cast %30 : vector<2x8xf32> to vector<2x8x1xf32>
    %32 = vector.extract_strided_slice %31 {offsets = [0, 0, 0], sizes = [1, 8, 1], strides = [1, 1, 1]} : vector<2x8x1xf32> to vector<1x8x1xf32>
    %33 = vector.shape_cast %32 : vector<1x8x1xf32> to vector<8x1xf32>
    %34 = vector.extract_strided_slice %31 {offsets = [1, 0, 0], sizes = [1, 8, 1], strides = [1, 1, 1]} : vector<2x8x1xf32> to vector<1x8x1xf32>
    %35 = vector.shape_cast %34 : vector<1x8x1xf32> to vector<8x1xf32>
    %36 = arith.subf %33, %35 : vector<8x1xf32>
    %cst_12 = arith.constant 1.000000e+00 : f32
    %37 = vector.broadcast %cst_12 : f32 to vector<8x1xf32>
    %38 = arith.addf %36, %37 : vector<8x1xf32>
    %cst_13 = arith.constant 0.000000e+00 : f32
    %39 = vector.broadcast %cst_13 : f32 to vector<8x1xf32>
    %40 = arith.maximumf %38, %39 : vector<8x1xf32>
    %41 = arith.mulf %40, %10 : vector<8x1xf32>
    %42 = vector.shape_cast %41 : vector<8x1xf32> to vector<1x8x1xf32>
    %cst_14 = arith.constant dense<0.000000e+00> : vector<1xf32>
    %43 = vector.multi_reduction <add>, %42, %cst_14 [1, 2] : vector<1x8x1xf32> to vector<1xf32>
    %44 = vector.shape_cast %43 : vector<1xf32> to vector<1x1x1xf32>
    %45 = vector.extract %44[0, 0, 0] : f32 from vector<1x1x1xf32>
    %46 = arith.mulf %0, %0 : vector<4x8x32xf32>
    %cst_15 = arith.constant dense<0.000000e+00> : vector<4x8xf32>
    %47 = vector.multi_reduction <add>, %46, %cst_15 [2] : vector<4x8x32xf32> to vector<4x8xf32>
    %48 = vector.shape_cast %47 : vector<4x8xf32> to vector<4x8x1xf32>
    %cst_16 = arith.constant 1.000000e+00 : f32
    %49 = vector.broadcast %cst_16 : f32 to vector<4x8x1xf32>
    %50 = arith.subf %48, %49 : vector<4x8x1xf32>
    %cst_17 = arith.constant 0.000000e+00 : f32
    %51 = vector.broadcast %cst_17 : f32 to vector<4x8x1xf32>
    %52 = arith.maximumf %50, %51 : vector<4x8x1xf32>
    %53 = vector.shape_cast %10 : vector<8x1xf32> to vector<1x8x1xf32>
    %54 = vector.broadcast %53 : vector<1x8x1xf32> to vector<4x8x1xf32>
    %55 = arith.mulf %52, %54 : vector<4x8x1xf32>
    %56 = vector.shape_cast %55 : vector<4x8x1xf32> to vector<1x4x8x1xf32>
    %cst_18 = arith.constant dense<0.000000e+00> : vector<1xf32>
    %57 = vector.multi_reduction <add>, %56, %cst_18 [1, 2, 3] : vector<1x4x8x1xf32> to vector<1xf32>
    %58 = vector.shape_cast %57 : vector<1xf32> to vector<1x1x1x1xf32>
    %59 = vector.extract %58[0, 0, 0, 0] : f32 from vector<1x1x1x1xf32>
    %60 = arith.mulf %2, %1 : vector<2x8x32xf32>
    %cst_19 = arith.constant dense<0.000000e+00> : vector<2x8xf32>
    %61 = vector.multi_reduction <add>, %60, %cst_19 [2] : vector<2x8x32xf32> to vector<2x8xf32>
    %62 = vector.shape_cast %61 : vector<2x8xf32> to vector<2x8x1xf32>
    %63 = arith.mulf %62, %62 : vector<2x8x1xf32>
    %64 = math.absf %2 : vector<2x8x32xf32>
    %cst_20 = arith.constant dense<0.000000e+00> : vector<2x8xf32>
    %65 = vector.multi_reduction <add>, %64, %cst_20 [2] : vector<2x8x32xf32> to vector<2x8xf32>
    %66 = vector.shape_cast %65 : vector<2x8xf32> to vector<2x8x1xf32>
    %67 = arith.mulf %66, %66 : vector<2x8x1xf32>
    %cst_21 = arith.constant 1.000000e-30 : f32
    %68 = vector.broadcast %cst_21 : f32 to vector<2x8x1xf32>
    %69 = arith.maximumf %67, %68 : vector<2x8x1xf32>
    %70 = tpu.reciprocal %69 {approx = true} : vector<2x8x1xf32> -> vector<2x8x1xf32>
    %71 = arith.mulf %63, %70 : vector<2x8x1xf32>
    %cst_22 = arith.constant 1.000000e-10 : f32
    %72 = vector.broadcast %cst_22 : f32 to vector<2x8x1xf32>
    %73 = arith.subf %71, %72 : vector<2x8x1xf32>
    %cst_23 = arith.constant 0.000000e+00 : f32
    %74 = vector.broadcast %cst_23 : f32 to vector<2x8x1xf32>
    %75 = arith.maximumf %73, %74 : vector<2x8x1xf32>
    %76 = vector.shape_cast %10 : vector<8x1xf32> to vector<1x8x1xf32>
    %77 = vector.broadcast %76 : vector<1x8x1xf32> to vector<2x8x1xf32>
    %78 = arith.mulf %75, %77 : vector<2x8x1xf32>
    %79 = vector.shape_cast %78 : vector<2x8x1xf32> to vector<1x2x8x1xf32>
    %cst_24 = arith.constant dense<0.000000e+00> : vector<1xf32>
    %80 = vector.multi_reduction <add>, %79, %cst_24 [1, 2, 3] : vector<1x2x8x1xf32> to vector<1xf32>
    %81 = vector.shape_cast %80 : vector<1xf32> to vector<1x1x1x1xf32>
    %82 = vector.extract %81[0, 0, 0, 0] : f32 from vector<1x1x1x1xf32>
    %cst_25 = arith.constant 8.000000e+00 : f32
    %83 = arith.divf %45, %cst_25 : f32
    %cst_26 = arith.constant 3.200000e+01 : f32
    %84 = arith.divf %59, %cst_26 : f32
    %cst_27 = arith.constant 1.600000e+01 : f32
    %85 = arith.divf %82, %cst_27 : f32
    %86 = arith.addf %84, %85 : f32
    %cst_28 = arith.constant 1.000000e+00 : f32
    %87 = arith.mulf %cst_28, %86 : f32
    %88 = arith.addf %83, %87 : f32
    %89 = vector.broadcast %88 : f32 to vector<1x1x128xf32>
    %c0_29 = arith.constant 0 : index
    %c0_30 = arith.constant 0 : index
    %c0_31 = arith.constant 0 : index
    %90 = vector.load %arg4[%c0_29, %c0_30, %c0_31] : memref<1x1x128xf32, #tpu.memory_space<vmem>>, vector<1x1x128xf32>
    tpu.vector_store %arg4[%c0_29, %c0_30, %c0_31], %89 {strides = array<i32>} : memref<1x1x128xf32, #tpu.memory_space<vmem>>, vector<1x1x128xf32>,
    return
  }
  func.func @transform_0(%arg0: i32) -> (i32, i32, i32) {
    %c0_i32 = arith.constant 0 : i32
    %c0_i32_0 = arith.constant 0 : i32
    %c0_i32_1 = arith.constant 0 : i32
    return %c0_i32, %arg0, %c0_i32_0 : i32, i32, i32
  }
  func.func @transform_1(%arg0: i32) -> (i32, i32, i32) {
    %c0_i32 = arith.constant 0 : i32
    %c0_i32_0 = arith.constant 0 : i32
    %c0_i32_1 = arith.constant 0 : i32
    return %c0_i32, %arg0, %c0_i32_0 : i32, i32, i32
  }
  func.func @transform_2(%arg0: i32) -> (i32, i32, i32) {
    %c0_i32 = arith.constant 0 : i32
    %c0_i32_0 = arith.constant 0 : i32
    %c0_i32_1 = arith.constant 0 : i32
    return %c0_i32, %arg0, %c0_i32_0 : i32, i32, i32
  }
  func.func @transform_3(%arg0: i32) -> (i32, i32, i32) {
    %c0_i32 = arith.constant 0 : i32
    %c0_i32_0 = arith.constant 0 : i32
    %c0_i32_1 = arith.constant 0 : i32
    return %arg0, %c0_i32, %c0_i32_0 : i32, i32, i32
  }
}

</mosaic_0001>

<bundles_post_ra>
// kernel: transh_forward.1
= control target key start
LH: loop header
LB: loop body
LE: loop exit
PB: predicated region body
PF: predicated region fallthrough
CT: control target
= control target key end

     0   :  { %vm33_vm0 = vcmask 261120   ;;  %s323_s0 = inlined_call_operand.vmem [shape: f32[4,8,32], index: 0, kind: input, shape index: {}]   ;;  %s324_s1 = inlined_call_operand.vmem [shape: f32[2,8,32], index: 1, kind: input, shape index: {}]   ;;  %s325_s2 = inlined_call_operand.vmem [shape: f32[2,8,32], index: 2, kind: input, shape index: {}]   ;;  %s326_s3 = inlined_call_operand.hbm [shape: f32[1,1,128], index: 3, kind: output, shape index: {}]  }
   0x1   :  { %v19_v0 = vld [vmem:[%s324_s1] sm:$0xff]  ;;  %v20_v1 = vld [vmem:[%s324_s1 + $0x8] sm:$0xff] }
   0x2   :  { %8 = vsyncpa [#allocation3], 0  ;;  %v31_v2 = vmul.f32 %v19_v0, %v19_v0  ;;  %v32_v3 = vmul.f32 %v20_v1, %v20_v1  ;;  %v21_v6 = vld [vmem:[%s325_s2] sm:$0xff]  ;;  %v17_v18 = vld [vmem:[%s323_s0 + $0x10] sm:$0xff]  ;;  %vm74_vm1 = vcmask 7168   ;;  %s245_s30 = smov [#allocation2]  }
   0x3   :  { %v139_v7 = vand.u32 2147483647, %v21_v6  ;;  %v15_v8 = vld [vmem:[%s323_s0] sm:$0xff]  ;;  %v129_v11 = vmul.f32 %v21_v6, %v19_v0  ;;  %v16_v21 = vld [vmem:[%s323_s0 + $0x8] sm:$0xff]  ;;  %v18_v22 = vld [vmem:[%s323_s0 + $0x18] sm:$0xff]  ;;  %v87_v36 = vmul.f32 %v17_v18, %v17_v18  ;;  %s192_s4 = sshll.u32 %s245_s30, 4  ;;  %s193_s4 = int_to_ptr.vmem [resolvable:$true] %s192_s4 }
   0x4   :  { %v34_v4 = vsel %vm33_vm0, %v31_v2, 0.0  ;;  %v37_v5 = vsel %vm33_vm0, %v32_v3, 0.0  ;;  %v85_v10 = vmul.f32 %v15_v8, %v15_v8  ;;  %v46_v19 = vsub.f32 %v15_v8, %v17_v18  ;;  %v22_v27 = vld [vmem:[%s325_s2 + $0x8] sm:$0xff]  ;;  %s221_s8 = scalar_lea.vmem %s193_s4, 16  ;;  %s225_s9 = scalar_lea.vmem %s193_s4, 32 }
   0x5   :  { %35 = vadd.xlane.f32.xlu0 %v34_v4  ;;  %v141_v9 = vsel %vm33_vm0, %v139_v7, 0.0  ;;  %v131_v13 = vsel %vm33_vm0, %v129_v11, 0.0  ;;  %v47_v25 = vsub.f32 %v16_v21, %v18_v22  ;;  %v140_v31 = vand.u32 2147483647, %v22_v27  ;;  %p222_p0 = scmp.ne.s32.totalorder %s193_s4, %s221_s8  ;;  %p226_p1 = scmp.lt.s32.totalorder %s193_s4, %s193_s4 }
   0x6   :  { %v89_v12 = vsel %vm33_vm0, %v85_v10, 0.0  ;;  %v86_v34 = vmul.f32 %v16_v21, %v16_v21  ;;  %v95_v37 = vsel %vm33_vm0, %v87_v36, 0.0  ;;  %v130_v38 = vmul.f32 %v22_v27, %v20_v1  ;;  %p227_p2 = scmp.lt.s32.totalorder %s225_s9, %s221_s8 }
   0x7   :  { %v144_v33 = vsel %vm33_vm0, %v140_v31, 0.0  ;;  %v88_v48 = vmul.f32 %v18_v22, %v18_v22 }
   0x8   :  { %v92_v35 = vsel %vm33_vm0, %v86_v34, 0.0  ;;  %v134_v39 = vsel %vm33_vm0, %v130_v38, 0.0  ;;  %p228_p3 = por %p227_p2, %p226_p1 }
   0x9   :  { %38 = vadd.xlane.f32.xlu0 %v37_v5  ;;  %v98_v51 = vsel %vm33_vm0, %v88_v48, 0.0 }
   0xa   :  { %p229_p4 = pnand %p228_p3, %p222_p0 }
   0xd   :  { %142 = vadd.xlane.f32.xlu0 %v141_v9 }
  0x11   :  { %90 = vadd.xlane.f32.xlu0 %v89_v12 }
  0x15   :  { %132 = vadd.xlane.f32.xlu0 %v131_v13 }
  0x19   :  { %96 = vadd.xlane.f32.xlu0 %v95_v37 }
  0x92   :  { %v36_v14 = vpop.xlane.xlu0 %35 }
  0x93   :  { %v40_v15 = vmax.f32 %v36_v14, 1e-24 }
  0x95   :  { %213 = vrsqrt.f32 %v40_v15 }
  0x96   :  { %v39_v16 = vpop.xlane.xlu0 %38 }
  0x97   :  { %v41_v17 = vmax.f32 %v39_v16, 1e-24 }
  0x99   :  { %215 = vrsqrt.f32 %v41_v17 }
  0x9a   :  { %v143_v54 = vpop.xlane.xlu0 %142 }
  0x9b   :  { %v147_v56 = vmul.f32 %v143_v54, %v143_v54 }
  0x9d   :  { %v149_v58 = vmax.f32 %v147_v56, 1e-30 }
  0x9e   :  { %v91_v60 = vpop.xlane.xlu0 %90 }
  0x9f   :  { %v214_v20 = vpop.eup %213  ;;  %217 = vrcp.f32 %v149_v58 }
  0xa0   :  { %v44_v23 = vmul.f32 %v214_v20, %v19_v0  ;;  %v200_v0 = vadd.f32 -1.0, %v91_v60 }
  0xa2   :  { %v48_v24 = vmul.f32 %v46_v19, %v44_v23  ;;  %v133_v62 = vpop.xlane.xlu0 %132  ;;  %v105_v7 = vmax.f32 %v200_v0, 0.0 }
  0xa3   :  { %v216_v26 = vpop.eup %215  ;;  %v137_v4 = vmul.f32 %v133_v62, %v133_v62 }
  0xa4   :  { %v50_v28 = vsel %vm33_vm0, %v48_v24, 0.0  ;;  %v45_v29 = vmul.f32 %v216_v26, %v20_v1  ;;  %v113_v13 = vsel %vm74_vm1, %v105_v7, 0.0 }
  0xa5   :  { %51 = vadd.xlane.f32.xlu1 %v50_v28 }
  0xa6   :  { %v49_v30 = vmul.f32 %v47_v25, %v45_v29  ;;  %v97_v2 = vpop.xlane.xlu0 %96 }
  0xa7   :  { %v202_v9 = vadd.f32 -1.0, %v97_v2 }
  0xa8   :  { %v53_v32 = vsel %vm33_vm0, %v49_v30, 0.0 }
  0xa9   :  { %54 = vadd.xlane.f32.xlu1 %v53_v32  ;;  %v218_v3 = vpop.eup %217  ;;  %v107_v15 = vmax.f32 %v202_v9, 0.0 }
  0xaa   :  { %v153_v10 = vmul.f32 %v218_v3, %v137_v4 }
  0xab   :  { %v116_v21 = vsel %vm74_vm1, %v107_v15, 0.0 }
  0xac   :  { %v204_v16 = vadd.f32 -1e-10, %v153_v10 }
  0xad   :  { %145 = vadd.xlane.f32.xlu1 %v144_v33 }
  0xae   :  { %v157_v24 = vmax.f32 %v204_v16, 0.0 }
  0xb0   :  { %v161_v33 = vsel %vm74_vm1, %v157_v24, 0.0 }
  0xb1   :  { %93 = vadd.xlane.f32.xlu1 %v92_v35 }
  0xb5   :  { %135 = vadd.xlane.f32.xlu1 %v134_v39 }
 0x132   :  { %v52_v40 = vpop.xlane.xlu1 %51 }
 0x133   :  { %v56_v41 = vmul.f32 %v52_v40, %v44_v23 }
 0x135   :  { %v58_v42 = vsub.f32 %v46_v19, %v56_v41 }
 0x136   :  { %v55_v43 = vpop.xlane.xlu1 %54 }
 0x137   :  { %v57_v44 = vmul.f32 %v55_v43, %v45_v29  ;;  %v60_v45 = vadd.f32 %v58_v42, %v21_v6 }
 0x139   :  { %v59_v46 = vsub.f32 %v47_v25, %v57_v44  ;;  %v62_v47 = vand.u32 2147483647, %v60_v45 }
 0x13a   :  { %v146_v55 = vpop.xlane.xlu1 %145 }
 0x13b   :  { %v64_v49 = vsel %vm33_vm0, %v62_v47, 0.0  ;;  %v61_v50 = vadd.f32 %v59_v46, %v22_v27  ;;  %v148_v57 = vmul.f32 %v146_v55, %v146_v55 }
 0x13c   :  { %65 = vadd.xlane.f32.xlu1 %v64_v49 }
 0x13d   :  { %v63_v52 = vand.u32 2147483647, %v61_v50  ;;  %v150_v59 = vmax.f32 %v148_v57, 1e-30 }
 0x13e   :  { %v94_v61 = vpop.xlane.xlu1 %93 }
 0x13f   :  { %v67_v53 = vsel %vm33_vm0, %v63_v52, 0.0  ;;  %219 = vrcp.f32 %v150_v59  ;;  %v201_v1 = vadd.f32 -1.0, %v94_v61 }
 0x140   :  { %99 = vadd.xlane.f32.xlu1 %v98_v51  ;;  %68 = vadd.xlane.f32.xlu0 %v67_v53 }
 0x141   :  { %v106_v8 = vmax.f32 %v201_v1, 0.0 }
 0x142   :  { %v136_v63 = vpop.xlane.xlu1 %135 }
 0x143   :  { %v138_v5 = vmul.f32 %v136_v63, %v136_v63  ;;  %v114_v14 = vsel %vm74_vm1, %v106_v8, 0.0 }
 0x144   :  { %v115_v18 = vadd.f32 %v114_v14, %v113_v13 }
 0x146   :  { %v117_v28 = vadd.f32 %v116_v21, %v115_v18 }
 0x149   :  { %v220_v6 = vpop.eup %219 }
 0x14a   :  { %v154_v11 = vmul.f32 %v220_v6, %v138_v5 }
 0x14c   :  { %v205_v17 = vadd.f32 -1e-10, %v154_v11 }
 0x14e   :  { %v158_v25 = vmax.f32 %v205_v17, 0.0 }
 0x150   :  { %v162_v34 = vsel %vm74_vm1, %v158_v25, 0.0 }
 0x151   :  { %v163_v35 = vadd.f32 %v162_v34, %v161_v33 }
 0x1c9   :  { %v66_v12 = vpop.xlane.xlu1 %65 }
 0x1cd   :  { %v69_v19 = vpop.xlane.xlu0 %68  ;;  %v100_v20 = vpop.xlane.xlu1 %99 }
 0x1ce   :  { %v70_v22 = vsub.f32 %v66_v12, %v69_v19  ;;  %v203_v23 = vadd.f32 -1.0, %v100_v20 }
 0x1d0   :  { %v71_v26 = vadd.f32 1.0, %v70_v22  ;;  %v108_v27 = vmax.f32 %v203_v23, 0.0 }
 0x1d2   :  { %v72_v29 = vmax.f32 %v71_v26, 0.0  ;;  %v118_v30 = vsel %vm74_vm1, %v108_v27, 0.0 }
 0x1d3   :  { %v119_v31 = vadd.f32 %v118_v30, %v117_v28 }
 0x1d4   :  { %v75_v32 = vsel %vm74_vm1, %v72_v29, 0.0 }
 0x1d5   :  { %76 = vadd.xlane.f32.xlu0 %v75_v32  ;;  %120 = vadd.xlane.f32.xlu1 %v119_v31 }
 0x1d9   :  { %164 = vadd.xlane.f32.xlu0 %v163_v35 }
 0x262   :  { %v77_v36 = vpop.xlane.xlu0 %76  ;;  %v121_v37 = vpop.xlane.xlu1 %120 }
 0x263   :  { %v78_v38 = vrot.slane %v77_v36, 4  ;;  %v122_v39 = vrot.slane %v121_v37, 4 }
 0x265   :  { %v79_v40 = vadd.f32 %v78_v38, %v77_v36  ;;  %v123_v41 = vadd.f32 %v122_v39, %v121_v37 }
 0x266   :  { %v165_v42 = vpop.xlane.xlu0 %164 }
 0x267   :  { %v80_v43 = vrot.slane %v79_v40, 2  ;;  %v124_v44 = vrot.slane %v123_v41, 2  ;;  %v166_v45 = vrot.slane %v165_v42, 4 }
 0x269   :  { %v125_v46 = vadd.f32 %v124_v44, %v123_v41  ;;  %v167_v47 = vadd.f32 %v166_v45, %v165_v42  ;;  %v81_v48 = vadd.f32 %v80_v43, %v79_v40 }
 0x26b   :  { %v168_v49 = vrot.slane %v167_v47, 2  ;;  %v82_v50 = vrot.slane %v81_v48, 1  ;;  %v126_v51 = vrot.slane %v125_v46, 1 }
 0x26d   :  { %v169_v52 = vadd.f32 %v168_v49, %v167_v47  ;;  %v83_v53 = vadd.f32 %v82_v50, %v81_v48  ;;  %v127_v54 = vadd.f32 %v126_v51, %v125_v46 }
 0x26f   :  { %206 = vpush %v83_v53  ;;  %v170_v55 = vrot.slane %v169_v52, 1 }
 0x270   :  { %208 = vpush %v127_v54 }
 0x271   :  { %v171_v56 = vadd.f32 %v170_v55, %v169_v52 }
 0x273   :  { %210 = vpush %v171_v56 }
 0x2a0   :  { %s207_s0 = spop %206 }
 0x2a1   :  { %s209_s2 = spop %208  ;;  %s175_s5 = smul.f32 0.125, %s207_s0 }
 0x2a2   :  { %s178_s27 = smul.f32 0.03125, %s209_s2 }
 0x2a4   :  { %s211_s28 = spop %210 }
 0x2a5   :  { %s181_s29 = smul.f32 0.0625, %s211_s28 }
 0x2a7   :  { %s182_s6 = sadd.f32 %s181_s29, %s178_s27 }
 0x2a9   :  { %s183_s7 = sadd.f32 %s182_s6, %s175_s5 }
 0x2ab   :  { %v184_v57 = vstv %s183_s7 }
 0x2ac   :  { %185 = vst [vmem:[#allocation2] sm:$0x1] %v184_v57 }
 0x2ad   :  { %232 = shalt.err (!%p229_p4)
}
 0x2ae   :  { %s233_s12 = scalar_lea.hbm %s326_s3, 16 }
 0x2af   :  { %p234_p5 = scmp.ne.s32.totalorder %s326_s3, %s233_s12  ;;  %p237_p6 = scmp.lt.u32.totalorder %s233_s12, %s326_s3 }
 0x2b1   :  { %p239_p7 = pnand %p237_p6, %p234_p5 }
 0x2b3   :  { %242 = shalt.err (!%p239_p7)
}
 0x2b4   :  { %195 = dma.vmem_to_hbm [thread:$0]  %s193_s4, 16, %s326_s3, [#allocation3]  }
 0x2b5   :  { %243 = dma.done.wait [#allocation3], 16  }
 0x2b6   :  { %244 = vsyncadd [#allocation3], 4294967280 }
 0x2b7   :  { %199 = vsyncpa [#allocation3], 1 }

</bundles_post_ra>
